<compile_context>
chip_gen: v6e
topology: v6e:2x2x1
jax: 0.10.0
libtpu: 0.0.40
codegen_flags: <defaults>
</compile_context>

<pallas_src>
import jax
import jax.numpy as jnp
from jax.experimental import pallas as pl
from jax.experimental.pallas import tpu as pltpu

_NEG = -1e30  # finite "-inf" used to pad the vocab axis (safe in f32 and bf16)


def _generator_kernel(x_ref, wt_ref, b_ref, o_ref, m_ref, l_ref):
    # x_ref : (TR, D)   row tile of the flattened input (native dtype -> MXU)
    # wt_ref: (D, TV)   streamed vocab tile of the transposed projection weight
    # b_ref : (1, TV)   bias tile (f32; padded columns hold _NEG)
    # o_ref : (TR, TV)  log-probabilities, written only on the final pass
    # m_ref : (TR, 1)   running row max      (f32 VMEM scratch)
    # l_ref : (TR, 1)   running row sum-exp  (f32 VMEM scratch)
    p = pl.program_id(1)
    v = pl.program_id(2)
    last_pass = pl.num_programs(1) - 1

    @pl.when((p == 0) & (v == 0))
    def _():
        m_ref[...] = jnp.full(m_ref.shape, _NEG, m_ref.dtype)
        l_ref[...] = jnp.zeros(l_ref.shape, l_ref.dtype)

    # Native-dtype operands straight into the MXU; accumulate in f32.
    logits = jnp.dot(x_ref[...], wt_ref[...], preferred_element_type=jnp.float32)
    logits = logits + b_ref[...]                                    # (TR, TV) f32

    @pl.when(p == 0)  # online log-sum-exp accumulation over vocab tiles
    def _():
        m_prev = m_ref[...]
        m_new = jnp.maximum(m_prev, jnp.max(logits, axis=-1, keepdims=True))
        l_ref[...] = (l_ref[...] * jnp.exp(m_prev - m_new)
                      + jnp.sum(jnp.exp(logits - m_new), axis=-1, keepdims=True))
        m_ref[...] = m_new

    @pl.when(p == last_pass)  # finalize: shifted - log(sum-exp)
    def _():
        o_ref[...] = (logits - m_ref[...] - jnp.log(l_ref[...])).astype(o_ref.dtype)


def _round_up(n, m):
    return ((n + m - 1) // m) * m


def _round_down(n, m):
    return (n // m) * m


def generator_forward(x, weight, bias):
    """Equivalent of F.log_softmax(x @ weight.T + bias, dim=-1).

    x:      (..., d_model)
    weight: (vocab, d_model)   (PyTorch nn.Linear layout)
    bias:   (vocab,)
    """
    orig_shape = x.shape
    d_model = orig_shape[-1]
    vocab = weight.shape[0]
    out_dtype = x.dtype

    x2 = x.reshape(-1, d_model)
    R = x2.shape[0]
    bpe_in = jnp.dtype(x.dtype).itemsize
    bpe_out = jnp.dtype(out_dtype).itemsize

    # ---- Generation-aware VMEM limit (~52 MiB on v7x, ~104 MiB on v5e/v6e). ----
    try:
        vmem_cap = int(getattr(pltpu.get_tpu_info(), "vmem_capacity_bytes",
                               64 * 1024 * 1024))
    except Exception:
        vmem_cap = 64 * 1024 * 1024
    if vmem_cap <= 0:
        vmem_cap = 64 * 1024 * 1024
    vmem_limit = min((vmem_cap * 13) // 16, 112 * 1024 * 1024)
    budget = vmem_limit - 6 * 1024 * 1024   # headroom for compiler temporaries

    # Double-buffered streamed W^T tile + bias tile (tile-size independent of TR).
    def fixed_bytes(tv):
        return 2 * d_model * tv * bpe_in + 2 * tv * 4 + 4096

    # Double-buffered x / out tiles + ~3 live (TR, TV) f32 softmax intermediates + scratch.
    def per_row_bytes(tv):
        return 2 * d_model * bpe_in + 2 * tv * bpe_out + 3 * tv * 4 + 8

    # ---- Vocab tile: stream W^T, shrink TV until at least an 8-row slab fits. ----
    v_ceil = _round_up(vocab, 128)
    tv = min(1024, v_ceil)
    while tv > 128 and fixed_bytes(tv) + 8 * per_row_bytes(tv) > budget:
        tv = max(128, _round_down(tv // 2, 128))
    v_pad = _round_up(vocab, tv)
    nv = v_pad // tv
    num_passes = 1 if nv == 1 else 2   # single vocab tile -> fused single pass

    # ---- Row tile: as large as the budget allows, 256-multiples when big. ----
    cap = max(8, (budget - fixed_bytes(tv)) // per_row_bytes(tv))
    tr = min(1024, cap)
    r_ceil = _round_up(R, 8)
    # Prefer >= 4 row steps (2 per TensorCore on v7x) when the problem is big enough.
    if r_ceil >= 4 * 256 and 4 * tr > r_ceil:
        tr = max(256, _round_down(r_ceil // 4, 256))
    tr = min(tr, r_ceil)
    tr = _round_down(tr, 256) if tr >= 256 else max(8, _round_down(tr, 8))
    r_pad = _round_up(R, tr)
    nr = r_pad // tr

    # ---- Host-side padding / layout (vocab lane-dense, padded cols masked via bias). ----
    if r_pad != R:
        x2 = jnp.pad(x2, ((0, r_pad - R), (0, 0)))
    wt = weight.T.astype(x.dtype)                       # (d_model, vocab)
    b2 = bias.reshape(1, vocab).astype(jnp.float32)     # (1, vocab) kept in f32
    if v_pad != vocab:
        wt = jnp.pad(wt, ((0, 0), (0, v_pad - vocab)))
        b2 = jnp.pad(b2, ((0, 0), (0, v_pad - vocab)), constant_values=_NEG)

    cost = pl.CostEstimate(
        flops=2 * num_passes * r_pad * d_model * v_pad + 6 * r_pad * v_pad,
        transcendentals=r_pad * v_pad + r_pad,
        bytes_accessed=(nr * num_passes * d_model * v_pad * bpe_in
                        + r_pad * d_model * bpe_in
                        + r_pad * v_pad * bpe_out
                        + num_passes * v_pad * 4),
    )

    # TODO(synk): optionally fuse the downstream target-index gather / NLL loss so the
    #             full (R, V) log-prob matrix never has to be written to HBM at all.
    out = pl.pallas_call(
        _generator_kernel,
        out_shape=jax.ShapeDtypeStruct((r_pad, v_pad), out_dtype),
        grid_spec=pltpu.PrefetchScalarGridSpec(
            num_scalar_prefetch=0,
            grid=(nr, num_passes, nv),
            in_specs=[
                pl.BlockSpec((tr, d_model), lambda i, p, v: (i, 0)),  # x rows (resident per i)
                pl.BlockSpec((d_model, tv), lambda i, p, v: (0, v)),  # streamed W^T tile
                pl.BlockSpec((1, tv), lambda i, p, v: (0, v)),        # streamed bias tile
            ],
            # Pass 0 parks the output on block (i, 0) so nothing is written back until
            # the finalize pass fills each (i, v) block exactly once.
            out_specs=pl.BlockSpec((tr, tv), lambda i, p, v: (i, p * v)),
            scratch_shapes=[
                pltpu.VMEM((tr, 1), jnp.float32),   # running max
                pltpu.VMEM((tr, 1), jnp.float32),   # running sum-exp
            ],
        ),
        compiler_params=pltpu.CompilerParams(
            dimension_semantics=("parallel", "arbitrary", "arbitrary"),
            vmem_limit_bytes=int(vmem_limit),
        ),
        cost_estimate=cost,
    )(x2, wt, b2)

    out = out[:R, :vocab]
    return out.reshape(orig_shape[:-1] + (vocab,))


def _reference(x, weight, bias):
    logits = jnp.einsum("...d,vd->...v", x.astype(jnp.float32),
                        weight.astype(jnp.float32)) + bias.astype(jnp.float32)
    return jax.nn.log_softmax(logits, axis=-1).astype(x.dtype)


if __name__ == "__main__":
    key = jax.random.PRNGKey(0)

    # ---- Small shapes consistent with the module (single vocab tile, fused pass). ----
    batch, seq, d_model, vocab = 2, 8, 32, 128
    kx, kw, kb, k2 = jax.random.split(key, 4)

    x = jax.random.normal(kx, (batch, seq, d_model), dtype=jnp.float32)
    bound = 1.0 / (d_model ** 0.5)              # nn.Linear default init range
    weight = jax.random.uniform(kw, (vocab, d_model), jnp.float32, -bound, bound)
    bias = jax.random.uniform(kb, (vocab,), jnp.float32, -bound, bound)

    y = generator_forward(x, weight, bias)
    jax.block_until_ready(y)
    y_ref = _reference(x, weight, bias)
    assert y.shape == (batch, seq, vocab) and y.dtype == x.dtype
    assert jnp.allclose(y, y_ref, atol=1e-5, rtol=1e-5), "mismatch vs reference (small)"

    # ---- Exercise the vocab-tiled two-pass path (nv > 1, padded vocab columns). ----
    b2_, s2_, d2_, v2_ = 2, 4, 64, 1536          # tv=1024 -> v_pad=2048, 2 vocab tiles
    ka, kwa, kba = jax.random.split(k2, 3)
    x2_ = jax.random.normal(ka, (b2_, s2_, d2_), dtype=jnp.float32)
    bnd2 = 1.0 / (d2_ ** 0.5)
    w2_ = jax.random.uniform(kwa, (v2_, d2_), jnp.float32, -bnd2, bnd2)
    bi2_ = jax.random.uniform(kba, (v2_,), jnp.float32, -bnd2, bnd2)

    y2 = generator_forward(x2_, w2_, bi2_)
    jax.block_until_ready(y2)
    y2_ref = _reference(x2_, w2_, bi2_)
    assert y2.shape == (b2_, s2_, v2_) and y2.dtype == x2_.dtype
    assert jnp.allclose(y2, y2_ref, atol=1e-4, rtol=1e-5), "mismatch vs reference (tiled V)"

    print("KERNEL_OK")
</pallas_src>

<mosaic_0001>
module attributes {stable_mosaic.version = 11 : i64} {
  func.func @_generator_kernel(%arg0: i32, %arg1: i32, %arg2: i32, %arg3: memref<16x32xf32, #tpu.memory_space<vmem>>, %arg4: memref<32x128xf32, #tpu.memory_space<vmem>>, %arg5: memref<1x128xf32, #tpu.memory_space<vmem>>, %arg6: memref<16x128xf32, #tpu.memory_space<vmem>>, %arg7: memref<16x1xf32, #tpu.memory_space<vmem>>, %arg8: memref<16x1xf32, #tpu.memory_space<vmem>>) attributes {dimension_semantics = [#tpu.dimension_semantics<parallel>, #tpu.dimension_semantics<arbitrary>, #tpu.dimension_semantics<arbitrary>], iteration_bounds = array<i64: 1, 1, 1>, scalar_prefetch = 0 : i64, scratch_operands = 2 : i64, tpu.core_type = #tpu.core_type<tc>, window_params = [{transform_indices = @transform_0, window_bounds = array<i64: 16, 32>}, {transform_indices = @transform_1, window_bounds = array<i64: 32, 128>}, {transform_indices = @transform_2, window_bounds = array<i64: 1, 128>}, {transform_indices = @transform_3, window_bounds = array<i64: 16, 128>}]} {
    %c0_i32 = arith.constant 0 : i32
    %0 = arith.cmpi eq, %arg1, %c0_i32 : i32
    %c0_i32_0 = arith.constant 0 : i32
    %1 = arith.cmpi eq, %arg2, %c0_i32_0 : i32
    %2 = arith.andi %0, %1 : i1
    %3 = arith.extui %2 : i1 to i32
    %c0_i32_1 = arith.constant 0 : i32
    %4 = arith.cmpi ne, %3, %c0_i32_1 : i32
    scf.if %4 {
      %cst_11 = arith.constant -1.000000e+30 : f32
      %17 = vector.broadcast %cst_11 : f32 to vector<16x1xf32>
      %c0_12 = arith.constant 0 : index
      %c0_13 = arith.constant 0 : index
      %18 = vector.load %arg7[%c0_12, %c0_13] : memref<16x1xf32, #tpu.memory_space<vmem>>, vector<16x1xf32>
      tpu.vector_store %arg7[%c0_12, %c0_13], %17 {strides = array<i32>} : memref<16x1xf32, #tpu.memory_space<vmem>>, vector<16x1xf32>,
      %cst_14 = arith.constant 0.000000e+00 : f32
      %19 = vector.broadcast %cst_14 : f32 to vector<16x1xf32>
      %c0_15 = arith.constant 0 : index
      %c0_16 = arith.constant 0 : index
      %20 = vector.load %arg8[%c0_15, %c0_16] : memref<16x1xf32, #tpu.memory_space<vmem>>, vector<16x1xf32>
      tpu.vector_store %arg8[%c0_15, %c0_16], %19 {strides = array<i32>} : memref<16x1xf32, #tpu.memory_space<vmem>>, vector<16x1xf32>,
    } else {
    }
    %c0 = arith.constant 0 : index
    %c0_2 = arith.constant 0 : index
    %5 = vector.load %arg3[%c0, %c0_2] : memref<16x32xf32, #tpu.memory_space<vmem>>, vector<16x32xf32>
    %c0_3 = arith.constant 0 : index
    %c0_4 = arith.constant 0 : index
    %6 = vector.load %arg4[%c0_3, %c0_4] : memref<32x128xf32, #tpu.memory_space<vmem>>, vector<32x128xf32>
    %cst = arith.constant dense<0.000000e+00> : vector<16x128xf32>
    %7 = tpu.matmul %5, %6, %cst {dimension_numbers = #tpu.dot_dimension_numbers<[1], [0], [0], [1], [0, 0, 1, 1], [], []>} : vector<16x32xf32>, vector<32x128xf32>, vector<16x128xf32> -> vector<16x128xf32>
    %c0_5 = arith.constant 0 : index
    %c0_6 = arith.constant 0 : index
    %8 = vector.load %arg5[%c0_5, %c0_6] : memref<1x128xf32, #tpu.memory_space<vmem>>, vector<1x128xf32>
    %9 = vector.broadcast %8 : vector<1x128xf32> to vector<16x128xf32>
    %10 = arith.addf %7, %9 : vector<16x128xf32>
    %c0_i32_7 = arith.constant 0 : i32
    %11 = arith.cmpi eq, %arg1, %c0_i32_7 : i32
    %12 = arith.extui %11 : i1 to i32
    %c0_i32_8 = arith.constant 0 : i32
    %13 = arith.cmpi ne, %12, %c0_i32_8 : i32
    scf.if %13 {
      %c0_11 = arith.constant 0 : index
      %c0_12 = arith.constant 0 : index
      %17 = vector.load %arg7[%c0_11, %c0_12] : memref<16x1xf32, #tpu.memory_space<vmem>>, vector<16x1xf32>
      %cst_13 = arith.constant dense<0xFF800000> : vector<16xf32>
      %18 = vector.multi_reduction <maximumf>, %10, %cst_13 [1] : vector<16x128xf32> to vector<16xf32>
      %19 = vector.shape_cast %18 : vector<16xf32> to vector<16x1xf32>
      %20 = arith.maximumf %17, %19 : vector<16x1xf32>
      %c0_14 = arith.constant 0 : index
      %c0_15 = arith.constant 0 : index
      %21 = vector.load %arg8[%c0_14, %c0_15] : memref<16x1xf32, #tpu.memory_space<vmem>>, vector<16x1xf32>
      %22 = arith.subf %17, %20 : vector<16x1xf32>
      %23 = math.exp %22 : vector<16x1xf32>
      %24 = arith.mulf %21, %23 : vector<16x1xf32>
      %25 = vector.broadcast %20 : vector<16x1xf32> to vector<16x128xf32>
      %26 = arith.subf %10, %25 : vector<16x128xf32>
      %27 = math.exp %26 : vector<16x128xf32>
      %cst_16 = arith.constant dense<0.000000e+00> : vector<16xf32>
      %28 = vector.multi_reduction <add>, %27, %cst_16 [1] : vector<16x128xf32> to vector<16xf32>
      %29 = vector.shape_cast %28 : vector<16xf32> to vector<16x1xf32>
      %30 = arith.addf %24, %29 : vector<16x1xf32>
      %c0_17 = arith.constant 0 : index
      %c0_18 = arith.constant 0 : index
      %31 = vector.load %arg8[%c0_17, %c0_18] : memref<16x1xf32, #tpu.memory_space<vmem>>, vector<16x1xf32>
      tpu.vector_store %arg8[%c0_17, %c0_18], %30 {strides = array<i32>} : memref<16x1xf32, #tpu.memory_space<vmem>>, vector<16x1xf32>,
      %c0_19 = arith.constant 0 : index
      %c0_20 = arith.constant 0 : index
      %32 = vector.load %arg7[%c0_19, %c0_20] : memref<16x1xf32, #tpu.memory_space<vmem>>, vector<16x1xf32>
      tpu.vector_store %arg7[%c0_19, %c0_20], %20 {strides = array<i32>} : memref<16x1xf32, #tpu.memory_space<vmem>>, vector<16x1xf32>,
    } else {
    }
    %c0_i32_9 = arith.constant 0 : i32
    %14 = arith.cmpi eq, %arg1, %c0_i32_9 : i32
    %15 = arith.extui %14 : i1 to i32
    %c0_i32_10 = arith.constant 0 : i32
    %16 = arith.cmpi ne, %15, %c0_i32_10 : i32
    scf.if %16 {
      %c0_11 = arith.constant 0 : index
      %c0_12 = arith.constant 0 : index
      %17 = vector.load %arg7[%c0_11, %c0_12] : memref<16x1xf32, #tpu.memory_space<vmem>>, vector<16x1xf32>
      %18 = vector.broadcast %17 : vector<16x1xf32> to vector<16x128xf32>
      %19 = arith.subf %10, %18 : vector<16x128xf32>
      %c0_13 = arith.constant 0 : index
      %c0_14 = arith.constant 0 : index
      %20 = vector.load %arg8[%c0_13, %c0_14] : memref<16x1xf32, #tpu.memory_space<vmem>>, vector<16x1xf32>
      %21 = math.log %20 : vector<16x1xf32>
      %22 = vector.broadcast %21 : vector<16x1xf32> to vector<16x128xf32>
      %23 = arith.subf %19, %22 : vector<16x128xf32>
      %c0_15 = arith.constant 0 : index
      %c0_16 = arith.constant 0 : index
      %24 = vector.load %arg6[%c0_15, %c0_16] : memref<16x128xf32, #tpu.memory_space<vmem>>, vector<16x128xf32>
      tpu.vector_store %arg6[%c0_15, %c0_16], %23 {strides = array<i32>} : memref<16x128xf32, #tpu.memory_space<vmem>>, vector<16x128xf32>,
    } else {
    }
    return
  }
  func.func @transform_0(%arg0: i32, %arg1: i32, %arg2: i32) -> (i32, i32) {
    %c0_i32 = arith.constant 0 : i32
    %c0_i32_0 = arith.constant 0 : i32
    return %arg0, %c0_i32 : i32, i32
  }
  func.func @transform_1(%arg0: i32, %arg1: i32, %arg2: i32) -> (i32, i32) {
    %c0_i32 = arith.constant 0 : i32
    %c0_i32_0 = arith.constant 0 : i32
    return %c0_i32, %arg2 : i32, i32
  }
  func.func @transform_2(%arg0: i32, %arg1: i32, %arg2: i32) -> (i32, i32) {
    %c0_i32 = arith.constant 0 : i32
    %c0_i32_0 = arith.constant 0 : i32
    return %c0_i32, %arg2 : i32, i32
  }
  func.func @transform_3(%arg0: i32, %arg1: i32, %arg2: i32) -> (i32, i32) {
    %0 = arith.muli %arg1, %arg2 : i32
    %c0_i32 = arith.constant 0 : i32
    return %arg0, %0 : i32, i32
  }
}

</mosaic_0001>

<bundles_post_ra>
// kernel: tpu_custom_call.1
= control target key start
LH: loop header
LB: loop body
LE: loop exit
PB: predicated region body
PF: predicated region fallthrough
CT: control target
= control target key end

     0   :  { %8 = vsyncpa [#allocation5], 0  ;;  %s430_s0 = inlined_call_operand.hbm [shape: f32[16,32], index: 0, kind: input, shape index: {}]   ;;  %s431_s1 = inlined_call_operand.hbm [shape: f32[32,128], index: 1, kind: input, shape index: {}]   ;;  %s432_s2 = inlined_call_operand.vmem [shape: f32[1,128], index: 2, kind: input, shape index: {}]   ;;  %s433_s3 = inlined_call_operand.hbm [shape: f32[16,128], index: 3, kind: output, shape index: {}]  }
   0x1   :  { %9 = vsyncpa [#allocation8], 0 }
   0x2   :  { %10 = vsyncpa [#allocation6], 0  ;;  %s361_s12 = smov [#allocation4]  }
   0x3   :  { %s16_s13 = sshll.u32 %s361_s12, 4  ;;  %s17_s13 = int_to_ptr.vmem [resolvable:$true] %s16_s13 }
   0x4   :  { %s303_s14 = scalar_lea.vmem %s17_s13, 256  ;;  %p308_p1 = scmp.lt.s32.totalorder %s17_s13, %s17_s13 }
   0x5   :  { %p304_p0 = scmp.ne.s32.totalorder %s17_s13, %s303_s14  ;;  %p309_p2 = scmp.lt.s32.totalorder %s303_s14, %s303_s14 }
   0x7   :  { %p310_p3 = por %p309_p2, %p308_p1 }
   0x9   :  { %p311_p4 = pnand %p310_p3, %p304_p0 }
   0xb   :  { %314 = shalt.err (!%p311_p4)
}
   0xc   :  { %s362_s15 = smov 128   ;;  %s363_s16 = smov 8  }
   0xd   :  { %22 = dma.hbm_to_vmem [thread:$0]  %s430_s0, 256, %s17_s13, [#allocation5], %s362_s15, %s362_s15, %s363_s16  }
   0xe   :  { %s364_s19 = smov [#allocation7]  }
   0xf   :  { %s28_s20 = sshll.u32 %s364_s19, 4  ;;  %s29_s20 = int_to_ptr.vmem [resolvable:$true] %s28_s20 }
  0x10   :  { %s323_s21 = scalar_lea.vmem %s29_s20, 512  ;;  %p328_p6 = scmp.lt.s32.totalorder %s29_s20, %s29_s20 }
  0x11   :  { %p324_p5 = scmp.ne.s32.totalorder %s29_s20, %s323_s21  ;;  %p329_p7 = scmp.lt.s32.totalorder %s323_s21, %s323_s21 }
  0x13   :  { %p330_p8 = por %p329_p7, %p328_p6 }
  0x15   :  { %p331_p9 = pnand %p330_p8, %p324_p5 }
  0x17   :  { %334 = shalt.err (!%p331_p9)
}
  0x18   :  { %34 = dma.hbm_to_vmem [thread:$0]  %s431_s1, 512, %s29_s20, [#allocation8], %s362_s15, %s362_s15, %s363_s16  }
  0x19   :  { %355 = dma.done.wait [#allocation5], 256  }
  0x1a   :  { %356 = vsyncadd [#allocation5], 4294967040 }
  0x1b   :  { %357 = dma.done.wait [#allocation8], 512  }
  0x1c   :  { %358 = vsyncadd [#allocation8], 4294966784  ;;  %vm68_vm0 = vcmask 261120   ;;  %v60_v0 = vld [vmem:[#allocation7 + $0x18] sm:$0xff]  ;;  %v59_v1 = vld [vmem:[#allocation7 + $0x10] sm:$0xff]  ;;  %vm50_vm1 = vcmask 7168  }
  0x1d   :  { %262 = vmatprep.subr.mxu0 %v60_v0  ;;  %v55_v2 = vld [vmem:[#allocation4] sm:$0xff]  ;;  %v58_v3 = vld [vmem:[#allocation7 + $0x8] sm:$0xff]  ;;  %v57_v4 = vld [vmem:[#allocation7] sm:$0xff]  ;;  %v365_v6 = vmov -1e+30   ;;  %v366_v12 = vmov 0  }
  0x1e   :  { %263 = vmatpush3.msra.mxu0 %v60_v0  ;;  %270 = vmatprep.mubr.msk.f32.mxu0 %vm68_vm0, %v55_v2  ;;  %v56_v5 = vld [vmem:[#allocation4 + $0x8] sm:$0xff]  ;;  %51 = vst.msk [vmem:[#allocation2] sm:$0xff] %vm50_vm1, %v365_v6  ;;  %52 = vst.msk [vmem:[#allocation2 + $0x8] sm:$0xff] %vm50_vm1, %v365_v6  ;;  %v253_v8 = vld [vmem:[%s432_s2] ss:$0 sm:$0xff]  ;;  %v367_v13 = vmov 0.0  }
  0x1f   :  { %264 = vmatprep.subr.mxu0 %v59_v1  ;;  %281 = vset.pattern.permute.xlu1 %v366_v12  ;;  %53 = vst.msk [vmem:[#allocation3] sm:$0xff] %vm50_vm1, %v367_v13  ;;  %54 = vst.msk [vmem:[#allocation3 + $0x8] sm:$0xff] %vm50_vm1, %v367_v13  ;;  %s368_s2 = smov [#allocation9]  }
  0x20   :  { %265 = vmatpush3.msra.mxu0 %v59_v1  ;;  %282 = vset.pattern.permute.xlu0 %v366_v12  ;;  %s240_s24 = sshll.u32 %s368_s2, 4  ;;  %s241_s24 = int_to_ptr.vmem [resolvable:$true] %s240_s24 }
  0x21   :  { %266 = vmatprep.subr.mxu0 %v58_v3  ;;  %s335_s25 = scalar_lea.vmem %s241_s24, 256  ;;  %p340_p11 = scmp.lt.s32.totalorder %s241_s24, %s241_s24 }
  0x22   :  { %267 = vmatpush3.msra.mxu0 %v58_v3  ;;  %p336_p10 = scmp.ne.s32.totalorder %s241_s24, %s335_s25  ;;  %p341_p12 = scmp.lt.s32.totalorder %s335_s25, %s335_s25 }
  0x23   :  { %268 = vmatprep.subr.mxu0 %v57_v4 }
  0x24   :  { %269 = vmatpush3.msra.mxu0 %v57_v4  ;;  %p342_p13 = por %p341_p12, %p340_p11 }
  0x25   :  { %271 = vmatmul.mubr.msk.f32.vlgmr.msra.gmra.mxu0 %vm68_vm0, %v56_v5  ;;  %v153_v14 = vld [vmem:[#allocation2] sm:$0xff]  ;;  %v154_v17 = vld [vmem:[#allocation2 + $0x8] sm:$0xff] }
  0x26   :  { %v161_v35 = vld [vmem:[#allocation3] sm:$0xff]  ;;  %v162_v39 = vld [vmem:[#allocation3 + $0x8] sm:$0xff]  ;;  %p343_p0 = pnand %p342_p13, %p336_p10 }
  0xe5   :  { %v272_v7 = vpop.f32.mrf.mxu0 }
  0xe6   :  { %v411_v11 = vadd.f32 %v272_v7, %v253_v8 }
  0xe7   :  { %v141_v9 = vpop.f32.mrf.mxu0 }
  0xe8   :  { %v408_v10 = vadd.f32 %v253_v8, %v141_v9 }
  0xea   :  { %155 = vmax.xlane.f32.xlu0 %v408_v10 }
  0xee   :  { %157 = vmax.xlane.f32.xlu0 %v411_v11 }
 0x173   :  { %v156_v15 = vpop.xlane.xlu0 %155 }
 0x174   :  { %v159_v16 = vmax.f32 %v153_v14, %v156_v15 }
 0x176   :  { %v163_v18 = vsub.f32 %v153_v14, %v159_v16  ;;  %196 = vst.msk [vmem:[#allocation2] sm:$0xff] %vm50_vm1, %v159_v16  ;;  %173 = vperm.xlu1 %281, %v159_v16  }
 0x177   :  { %v158_v19 = vpop.xlane.xlu0 %157 }
 0x178   :  { %v160_v20 = vmax.f32 %v154_v17, %v158_v19  ;;  %v165_v32 = vmul.f32 1.442695, %v163_v18 }
 0x17a   :  { %v164_v21 = vsub.f32 %v154_v17, %v160_v20  ;;  %197 = vst.msk [vmem:[#allocation2 + $0x8] sm:$0xff] %vm50_vm1, %v160_v20  ;;  %178 = vperm.xlu1 %281, %v160_v20  }
 0x17c   :  { %v167_v33 = vmul.f32 1.442695, %v164_v21 }
 0x17d   :  { %v198_v31 = vld [vmem:[#allocation2] sm:$0xff] }
 0x181   :  { %v199_v30 = vld [vmem:[#allocation2 + $0x8] sm:$0xff] }
 0x1f1   :  { %v174_v22 = vpop.permute.xlu1 %173 }
 0x1f2   :  { %v181_v23 = vsub.f32 %v408_v10, %v174_v22 }
 0x1f4   :  { %v183_v24 = vmul.f32 1.442695, %v181_v23 }
 0x1f5   :  { %v179_v25 = vpop.permute.xlu1 %178 }
 0x1f6   :  { %283 = vpow2.f32 %v183_v24  ;;  %v182_v26 = vsub.f32 %v411_v11, %v179_v25 }
 0x1f8   :  { %v185_v27 = vmul.f32 1.442695, %v182_v26 }
 0x1fa   :  { %285 = vpow2.f32 %v185_v27 }
 0x1fb   :  { %287 = vpow2.f32 %v165_v32 }
 0x1fc   :  { %289 = vpow2.f32 %v167_v33 }
 0x203   :  { %v284_v28 = vpop.eup %283 }
 0x204   :  { %187 = vadd.xlane.f32.xlu0 %v284_v28 }
 0x207   :  { %v286_v29 = vpop.eup %285 }
 0x208   :  { %189 = vadd.xlane.f32.xlu1 %v286_v29  ;;  %v288_v34 = vpop.eup %287 }
 0x209   :  { %v169_v36 = vmul.f32 %v288_v34, %v161_v35  ;;  %v290_v37 = vpop.eup %289 }
 0x20a   :  { %v170_v41 = vmul.f32 %v290_v37, %v162_v39 }
 0x219   :  { %207 = vperm.xlu1 %281, %v199_v30  }
 0x21a   :  { %202 = vperm.xlu0 %282, %v198_v31  }
 0x28d   :  { %v188_v38 = vpop.xlane.xlu0 %187 }
 0x28e   :  { %v191_v40 = vadd.f32 %v188_v38, %v169_v36 }
 0x290   :  { %194 = vst.msk [vmem:[#allocation3] sm:$0xff] %vm50_vm1, %v191_v40 }
 0x291   :  { %v190_v42 = vpop.xlane.xlu1 %189 }
 0x292   :  { %v192_v43 = vadd.f32 %v190_v42, %v170_v41 }
 0x294   :  { %195 = vst.msk [vmem:[#allocation3 + $0x8] sm:$0xff] %vm50_vm1, %v192_v43 }
 0x295   :  { %v203_v50 = vpop.permute.xlu0 %202  ;;  %v208_v52 = vpop.permute.xlu1 %207 }
 0x296   :  { %v210_v51 = vsub.f32 %v408_v10, %v203_v50  ;;  %v211_v55 = vsub.f32 %v411_v11, %v208_v52 }
 0x297   :  { %v212_v44 = vld [vmem:[#allocation3] sm:$0xff] }
 0x298   :  { %291 = vlog2.f32 %v212_v44 }
 0x29b   :  { %v213_v45 = vld [vmem:[#allocation3 + $0x8] sm:$0xff] }
 0x29c   :  { %293 = vlog2.f32 %v213_v45 }
 0x2a5   :  { %v292_v46 = vpop.eup %291 }
 0x2a6   :  { %v215_v47 = vmul.f32 0.6931472, %v292_v46 }
 0x2a8   :  { %220 = vperm.xlu0 %282, %v215_v47  }
 0x2a9   :  { %v294_v48 = vpop.eup %293 }
 0x2aa   :  { %v217_v49 = vmul.f32 0.6931472, %v294_v48 }
 0x2ac   :  { %225 = vperm.xlu0 %282, %v217_v49  }
 0x323   :  { %v221_v53 = vpop.permute.xlu0 %220 }
 0x324   :  { %v228_v54 = vsub.f32 %v210_v51, %v221_v53 }
 0x326   :  { %230 = vst [vmem:[#allocation9] sm:$0xff] %v228_v54 }
 0x327   :  { %v226_v56 = vpop.permute.xlu0 %225 }
 0x328   :  { %v229_v57 = vsub.f32 %v211_v55, %v226_v56 }
 0x32a   :  { %231 = vst [vmem:[#allocation9 + $0x8] sm:$0xff] %v229_v57 }
 0x32b   :  { %346 = shalt.err (!%p343_p0)
}
 0x32c   :  { %246 = dma.vmem_to_hbm [thread:$0]  %s241_s24, 256, %s433_s3, [#allocation6], %s362_s15, %s362_s15, %s363_s16  }
 0x32d   :  { %359 = dma.done.wait [#allocation6], 256  }
 0x32e   :  { %360 = vsyncadd [#allocation6], 4294967040 }
 0x32f   :  { %250 = vsyncpa [#allocation5], 1 }
 0x330   :  { %251 = vsyncpa [#allocation8], 1 }
 0x331   :  { %252 = vsyncpa [#allocation6], 1 }

</bundles_post_ra>
